<compile_context>
chip_gen: v7x
topology: tpu7x:2x2x1
jax: 0.10.0
libtpu: 0.0.40
codegen_flags: <defaults>
</compile_context>

<pallas_src>
import functools

import jax
import jax.numpy as jnp
from jax.experimental import pallas as pl
from jax.experimental.pallas import tpu as pltpu

LOGITRANGE = 100.0


def _round_up(x, m):
    return ((x + m - 1) // m) * m


def _pwlinear_kernel(steps_ref, v1_ref, slope_ref, x_ref, out_ref, *, n_knots):
    """steps_ref / v1_ref / slope_ref: SMEM (n_knots,) f32 lookup tables.
    x_ref / out_ref: VMEM (TB, C) tile (C = full class dim)."""
    x = x_ref[...].astype(jnp.float32)                        # (TB, C)

    # log-softmax along classes (stable logsumexp), matching torch.logsumexp(dim=1).
    m = jnp.max(x, axis=-1, keepdims=True)
    lse = m + jnp.log(jnp.sum(jnp.exp(x - m), axis=-1, keepdims=True))
    negx = lse - x                                            # -log_softmax(x) >= 0

    # Segment lookup.  steps are sorted ascending with steps[0] == 0 <= negx, so the
    # knot-0 term is hoisted into the init and each later knot costs 1 cmp + 2 selects:
    #   J  = max{j : negx >= steps_j}
    #   V1 = (cumsum|slops|[J] - 1) * delta                (pre-scaled -> v1_ref[J])
    #   (V2 - V1)/delta = |slops[J+1]| (0 past last knot)  (            slope_ref[J])
    v1 = jnp.full_like(negx, v1_ref[0])
    slope = jnp.full_like(negx, slope_ref[0])
    for j in range(1, n_knots):                               # static, small unroll
        pred = negx >= steps_ref[j]
        v1 = jnp.where(pred, v1_ref[j], v1)
        slope = jnp.where(pred, slope_ref[j], slope)

    final = v1 + slope * (negx - v1)
    out_ref[...] = (-final).astype(out_ref.dtype)


def pwlinear_model(logits, steps, slops, *, segments,
                   max_tile_rows=4096, tile_vmem_budget_bytes=24 * 1024 * 1024):
    """Pallas implementation of PWLinearModel.forward.

    logits: (B, C) float (any float dtype; output matches it)
    steps:  (segments+1,) -- MUST be linspace(0, LOGITRANGE, segments+1): sorted
            ascending with uniform spacing == LOGITRANGE/segments.  The merged
            select-chain relies on that spacing (as does the PyTorch module).
    slops:  (segments+1,) learnable slopes.
    """
    B, C = logits.shape
    n_knots = segments + 1
    delta = float(LOGITRANGE) / float(segments)

    # ----- scalar parameter prep (O(n_knots) in the wrapper, negligible) -----
    steps_f = steps.astype(jnp.float32)
    aslops = jnp.abs(slops).astype(jnp.float32)
    prefix = jnp.cumsum(aslops)
    v1_tab = (prefix - 1.0) * jnp.float32(delta)              # pre-scaled V1 per segment
    slope_tab = jnp.concatenate(                              # (V2-V1)/delta per segment
        [aslops[1:], jnp.zeros((1,), jnp.float32)])

    # ----- batch tile sizing -----
    C_lane = _round_up(C, 128)                                # physical lane footprint
    itemsize = jnp.dtype(logits.dtype).itemsize
    # in + out double buffers plus ~5 f32 elementwise temporaries per row.
    per_row_bytes = C_lane * (4 * itemsize + 5 * 4)
    TB = max(1, tile_vmem_budget_bytes // per_row_bytes)
    TB = min(TB, max_tile_rows)
    if B >= 16:
        # keep >= 2 grid steps so v7x megacore can shard the batch axis
        TB = min(TB, _round_up(-(-B // 2), 8))
    TB = min(TB, _round_up(B, 8))
    TB = max(8, (TB // 8) * 8)
    if B < 8:
        TB = B                                                # full row dim is always legal
    grid = (-(-B // TB),)
    vmem_limit = int(min(96 * 1024 * 1024,
                         max(32 * 1024 * 1024, 3 * per_row_bytes * TB)))
    # TODO(synk): for extreme class counts (per-block footprint near VMEM), stream the
    # class axis in chunks inside the kernel (two-pass logsumexp) instead of one block.

    kernel = functools.partial(_pwlinear_kernel, n_knots=n_knots)

    return pl.pallas_call(
        kernel,
        out_shape=jax.ShapeDtypeStruct((B, C), logits.dtype),
        grid=grid,
        in_specs=[
            pl.BlockSpec(memory_space=pltpu.MemorySpace.SMEM),   # steps
            pl.BlockSpec(memory_space=pltpu.MemorySpace.SMEM),   # (cumsum|slops|-1)*delta
            pl.BlockSpec(memory_space=pltpu.MemorySpace.SMEM),   # next-segment |slops|
            pl.BlockSpec((TB, C), lambda i: (i, 0)),             # logits tile (full C)
        ],
        out_specs=pl.BlockSpec((TB, C), lambda i: (i, 0)),
        compiler_params=pltpu.CompilerParams(
            dimension_semantics=("parallel",),
            vmem_limit_bytes=vmem_limit,
        ),
    )(steps_f, v1_tab, slope_tab, logits)


def pwlinear_reference(logits, steps, slops, *, segments):
    """Pure-JAX reference mirroring the PyTorch module formula exactly."""
    delta = LOGITRANGE / segments
    z = logits.astype(jnp.float32)
    z = z - jax.nn.logsumexp(z, axis=1, keepdims=True)
    inp = z.reshape(-1, 1)                                    # (N, 1)
    aslops = jnp.abs(slops)[None, :].astype(jnp.float32)
    v1 = jnp.sum((-inp >= steps[None, :]) * aslops, axis=1) - 1.0
    v1 = v1 * delta
    v2 = jnp.sum((-inp + delta >= steps[None, :]) * aslops, axis=1) - 1.0
    v2 = v2 * delta
    final = v1 + (v2 - v1) / delta * (-inp.reshape(-1) - v1)
    return (-final).reshape(logits.shape).astype(logits.dtype)


if __name__ == "__main__":
    segments = 8
    B, C = 8, 16

    key = jax.random.PRNGKey(0)
    k0, k1 = jax.random.split(key)
    # Scale so -log_softmax spans a few segments (delta = 12.5).
    logits = jax.random.normal(k0, (B, C), dtype=jnp.float32) * 10.0

    # Parameters as in PiecewiseLinear.__init__ (steps fixed; slops learnable ->
    # perturb them so the |slops| prefix / next-slope tables are actually exercised).
    steps = jnp.linspace(0.0, LOGITRANGE, segments + 1, dtype=jnp.float32)
    slops = jnp.ones((segments + 1,), dtype=jnp.float32) \
        + 0.3 * jax.random.normal(k1, (segments + 1,), dtype=jnp.float32)

    out = pwlinear_model(logits, steps, slops, segments=segments)
    out = jax.block_until_ready(out)

    ref = pwlinear_reference(logits, steps, slops, segments=segments)
    assert out.shape == logits.shape and out.dtype == logits.dtype
    assert jnp.allclose(out, ref, atol=1e-3, rtol=1e-4), (out, ref)

    print("KERNEL_OK")
</pallas_src>

<mosaic_0001>
module attributes {stable_mosaic.version = 11 : i64} {
  func.func @_pwlinear_kernel(%arg0: i32, %arg1: memref<9xf32, #tpu.memory_space<smem>>, %arg2: memref<9xf32, #tpu.memory_space<smem>>, %arg3: memref<9xf32, #tpu.memory_space<smem>>, %arg4: memref<8x16xf32, #tpu.memory_space<vmem>>, %arg5: memref<8x16xf32, #tpu.memory_space<vmem>>) attributes {dimension_semantics = [#tpu.dimension_semantics<parallel>], iteration_bounds = array<i64: 1>, scalar_prefetch = 0 : i64, scratch_operands = 0 : i64, tpu.core_type = #tpu.core_type<tc>, window_params = [{transform_indices = @transform_0, window_bounds = array<i64: 9>}, {transform_indices = @transform_1, window_bounds = array<i64: 9>}, {transform_indices = @transform_2, window_bounds = array<i64: 9>}, {transform_indices = @transform_3, window_bounds = array<i64: 8, 16>}, {transform_indices = @transform_4, window_bounds = array<i64: 8, 16>}]} {
    %c0 = arith.constant 0 : index
    %c0_0 = arith.constant 0 : index
    %0 = vector.load %arg4[%c0, %c0_0] : memref<8x16xf32, #tpu.memory_space<vmem>>, vector<8x16xf32>
    %cst = arith.constant dense<0xFF800000> : vector<8xf32>
    %1 = vector.multi_reduction <maximumf>, %0, %cst [1] : vector<8x16xf32> to vector<8xf32>
    %2 = vector.shape_cast %1 : vector<8xf32> to vector<8x1xf32>
    %3 = vector.broadcast %2 : vector<8x1xf32> to vector<8x16xf32>
    %4 = arith.subf %0, %3 : vector<8x16xf32>
    %5 = math.exp %4 : vector<8x16xf32>
    %cst_1 = arith.constant dense<0.000000e+00> : vector<8xf32>
    %6 = vector.multi_reduction <add>, %5, %cst_1 [1] : vector<8x16xf32> to vector<8xf32>
    %7 = vector.shape_cast %6 : vector<8xf32> to vector<8x1xf32>
    %8 = math.log %7 : vector<8x1xf32>
    %9 = arith.addf %2, %8 : vector<8x1xf32>
    %10 = vector.broadcast %9 : vector<8x1xf32> to vector<8x16xf32>
    %11 = arith.subf %10, %0 : vector<8x16xf32>
    %c0_2 = arith.constant 0 : index
    %12 = memref.load %arg2[%c0_2] : memref<9xf32, #tpu.memory_space<smem>>
    %13 = vector.broadcast %12 : f32 to vector<8x16xf32>
    %c0_3 = arith.constant 0 : index
    %14 = memref.load %arg3[%c0_3] : memref<9xf32, #tpu.memory_space<smem>>
    %15 = vector.broadcast %14 : f32 to vector<8x16xf32>
    %c1 = arith.constant 1 : index
    %16 = memref.load %arg1[%c1] : memref<9xf32, #tpu.memory_space<smem>>
    %17 = vector.broadcast %16 : f32 to vector<8x16xf32>
    %18 = arith.cmpf oge, %11, %17 : vector<8x16xf32>
    %c1_4 = arith.constant 1 : index
    %19 = memref.load %arg2[%c1_4] : memref<9xf32, #tpu.memory_space<smem>>
    %20 = vector.broadcast %19 : f32 to vector<8x16xf32>
    %21 = arith.select %18, %20, %13 : vector<8x16xi1>, vector<8x16xf32>
    %c1_5 = arith.constant 1 : index
    %22 = memref.load %arg3[%c1_5] : memref<9xf32, #tpu.memory_space<smem>>
    %23 = vector.broadcast %22 : f32 to vector<8x16xf32>
    %24 = arith.select %18, %23, %15 : vector<8x16xi1>, vector<8x16xf32>
    %c2 = arith.constant 2 : index
    %25 = memref.load %arg1[%c2] : memref<9xf32, #tpu.memory_space<smem>>
    %26 = vector.broadcast %25 : f32 to vector<8x16xf32>
    %27 = arith.cmpf oge, %11, %26 : vector<8x16xf32>
    %c2_6 = arith.constant 2 : index
    %28 = memref.load %arg2[%c2_6] : memref<9xf32, #tpu.memory_space<smem>>
    %29 = vector.broadcast %28 : f32 to vector<8x16xf32>
    %30 = arith.select %27, %29, %21 : vector<8x16xi1>, vector<8x16xf32>
    %c2_7 = arith.constant 2 : index
    %31 = memref.load %arg3[%c2_7] : memref<9xf32, #tpu.memory_space<smem>>
    %32 = vector.broadcast %31 : f32 to vector<8x16xf32>
    %33 = arith.select %27, %32, %24 : vector<8x16xi1>, vector<8x16xf32>
    %c3 = arith.constant 3 : index
    %34 = memref.load %arg1[%c3] : memref<9xf32, #tpu.memory_space<smem>>
    %35 = vector.broadcast %34 : f32 to vector<8x16xf32>
    %36 = arith.cmpf oge, %11, %35 : vector<8x16xf32>
    %c3_8 = arith.constant 3 : index
    %37 = memref.load %arg2[%c3_8] : memref<9xf32, #tpu.memory_space<smem>>
    %38 = vector.broadcast %37 : f32 to vector<8x16xf32>
    %39 = arith.select %36, %38, %30 : vector<8x16xi1>, vector<8x16xf32>
    %c3_9 = arith.constant 3 : index
    %40 = memref.load %arg3[%c3_9] : memref<9xf32, #tpu.memory_space<smem>>
    %41 = vector.broadcast %40 : f32 to vector<8x16xf32>
    %42 = arith.select %36, %41, %33 : vector<8x16xi1>, vector<8x16xf32>
    %c4 = arith.constant 4 : index
    %43 = memref.load %arg1[%c4] : memref<9xf32, #tpu.memory_space<smem>>
    %44 = vector.broadcast %43 : f32 to vector<8x16xf32>
    %45 = arith.cmpf oge, %11, %44 : vector<8x16xf32>
    %c4_10 = arith.constant 4 : index
    %46 = memref.load %arg2[%c4_10] : memref<9xf32, #tpu.memory_space<smem>>
    %47 = vector.broadcast %46 : f32 to vector<8x16xf32>
    %48 = arith.select %45, %47, %39 : vector<8x16xi1>, vector<8x16xf32>
    %c4_11 = arith.constant 4 : index
    %49 = memref.load %arg3[%c4_11] : memref<9xf32, #tpu.memory_space<smem>>
    %50 = vector.broadcast %49 : f32 to vector<8x16xf32>
    %51 = arith.select %45, %50, %42 : vector<8x16xi1>, vector<8x16xf32>
    %c5 = arith.constant 5 : index
    %52 = memref.load %arg1[%c5] : memref<9xf32, #tpu.memory_space<smem>>
    %53 = vector.broadcast %52 : f32 to vector<8x16xf32>
    %54 = arith.cmpf oge, %11, %53 : vector<8x16xf32>
    %c5_12 = arith.constant 5 : index
    %55 = memref.load %arg2[%c5_12] : memref<9xf32, #tpu.memory_space<smem>>
    %56 = vector.broadcast %55 : f32 to vector<8x16xf32>
    %57 = arith.select %54, %56, %48 : vector<8x16xi1>, vector<8x16xf32>
    %c5_13 = arith.constant 5 : index
    %58 = memref.load %arg3[%c5_13] : memref<9xf32, #tpu.memory_space<smem>>
    %59 = vector.broadcast %58 : f32 to vector<8x16xf32>
    %60 = arith.select %54, %59, %51 : vector<8x16xi1>, vector<8x16xf32>
    %c6 = arith.constant 6 : index
    %61 = memref.load %arg1[%c6] : memref<9xf32, #tpu.memory_space<smem>>
    %62 = vector.broadcast %61 : f32 to vector<8x16xf32>
    %63 = arith.cmpf oge, %11, %62 : vector<8x16xf32>
    %c6_14 = arith.constant 6 : index
    %64 = memref.load %arg2[%c6_14] : memref<9xf32, #tpu.memory_space<smem>>
    %65 = vector.broadcast %64 : f32 to vector<8x16xf32>
    %66 = arith.select %63, %65, %57 : vector<8x16xi1>, vector<8x16xf32>
    %c6_15 = arith.constant 6 : index
    %67 = memref.load %arg3[%c6_15] : memref<9xf32, #tpu.memory_space<smem>>
    %68 = vector.broadcast %67 : f32 to vector<8x16xf32>
    %69 = arith.select %63, %68, %60 : vector<8x16xi1>, vector<8x16xf32>
    %c7 = arith.constant 7 : index
    %70 = memref.load %arg1[%c7] : memref<9xf32, #tpu.memory_space<smem>>
    %71 = vector.broadcast %70 : f32 to vector<8x16xf32>
    %72 = arith.cmpf oge, %11, %71 : vector<8x16xf32>
    %c7_16 = arith.constant 7 : index
    %73 = memref.load %arg2[%c7_16] : memref<9xf32, #tpu.memory_space<smem>>
    %74 = vector.broadcast %73 : f32 to vector<8x16xf32>
    %75 = arith.select %72, %74, %66 : vector<8x16xi1>, vector<8x16xf32>
    %c7_17 = arith.constant 7 : index
    %76 = memref.load %arg3[%c7_17] : memref<9xf32, #tpu.memory_space<smem>>
    %77 = vector.broadcast %76 : f32 to vector<8x16xf32>
    %78 = arith.select %72, %77, %69 : vector<8x16xi1>, vector<8x16xf32>
    %c8 = arith.constant 8 : index
    %79 = memref.load %arg1[%c8] : memref<9xf32, #tpu.memory_space<smem>>
    %80 = vector.broadcast %79 : f32 to vector<8x16xf32>
    %81 = arith.cmpf oge, %11, %80 : vector<8x16xf32>
    %c8_18 = arith.constant 8 : index
    %82 = memref.load %arg2[%c8_18] : memref<9xf32, #tpu.memory_space<smem>>
    %83 = vector.broadcast %82 : f32 to vector<8x16xf32>
    %84 = arith.select %81, %83, %75 : vector<8x16xi1>, vector<8x16xf32>
    %c8_19 = arith.constant 8 : index
    %85 = memref.load %arg3[%c8_19] : memref<9xf32, #tpu.memory_space<smem>>
    %86 = vector.broadcast %85 : f32 to vector<8x16xf32>
    %87 = arith.select %81, %86, %78 : vector<8x16xi1>, vector<8x16xf32>
    %88 = arith.subf %11, %84 : vector<8x16xf32>
    %89 = arith.mulf %87, %88 : vector<8x16xf32>
    %90 = arith.addf %84, %89 : vector<8x16xf32>
    %cst_20 = arith.constant 0.000000e+00 : f32
    %91 = vector.broadcast %cst_20 : f32 to vector<8x16xf32>
    %92 = arith.subf %91, %90 : vector<8x16xf32>
    %c0_21 = arith.constant 0 : index
    %c0_22 = arith.constant 0 : index
    %93 = vector.load %arg5[%c0_21, %c0_22] : memref<8x16xf32, #tpu.memory_space<vmem>>, vector<8x16xf32>
    tpu.vector_store %arg5[%c0_21, %c0_22], %92 {strides = array<i32>} : memref<8x16xf32, #tpu.memory_space<vmem>>, vector<8x16xf32>,
    return
  }
  func.func @transform_0(%arg0: i32) -> i32 {
    %c0_i32 = arith.constant 0 : i32
    %c0_i32_0 = arith.constant 0 : i32
    return %c0_i32 : i32
  }
  func.func @transform_1(%arg0: i32) -> i32 {
    %c0_i32 = arith.constant 0 : i32
    %c0_i32_0 = arith.constant 0 : i32
    return %c0_i32 : i32
  }
  func.func @transform_2(%arg0: i32) -> i32 {
    %c0_i32 = arith.constant 0 : i32
    %c0_i32_0 = arith.constant 0 : i32
    return %c0_i32 : i32
  }
  func.func @transform_3(%arg0: i32) -> (i32, i32) {
    %c0_i32 = arith.constant 0 : i32
    %c0_i32_0 = arith.constant 0 : i32
    return %arg0, %c0_i32 : i32, i32
  }
  func.func @transform_4(%arg0: i32) -> (i32, i32) {
    %c0_i32 = arith.constant 0 : i32
    %c0_i32_0 = arith.constant 0 : i32
    return %arg0, %c0_i32 : i32, i32
  }
}

</mosaic_0001>

<bundles_post_ra>
// kernel: tpu_custom_call.1
= control target key start
LH: loop header
LB: loop body
LE: loop exit
PB: predicated region body
PF: predicated region fallthrough
CT: control target
= control target key end

     0   :  { %9 = vsyncpa [#allocation4], 0  ;;  %s405_s0 = inlined_call_operand.hbm [shape: f32[9], index: 0, kind: input, shape index: {}]   ;;  %s406_s1 = inlined_call_operand.vmem [shape: f32[9], index: 1, kind: input, shape index: {}]   ;;  %s407_s2 = inlined_call_operand.vmem [shape: f32[9], index: 2, kind: input, shape index: {}]   ;;  %s408_s3 = inlined_call_operand.vmem [shape: f32[8,16], index: 3, kind: input, shape index: {}]   ;;  %s409_s4 = inlined_call_operand.hbm [shape: f32[8,16], index: 4, kind: output, shape index: {}]  }
   0x1   :  { %10 = vsyncpa [#allocation5], 0 }
   0x2   :  { %11 = vsyncpa [#allocation8], 0 }
   0x3   :  { %12 = vsyncpa [#allocation3], 0  ;;  %s27_s17 = sshll.u32 %s406_s1, 4  ;;  %s198_s20 = scalar_lea.hbm %s405_s0, 16  ;;  %s28_s17 = int_to_ptr.vmem [resolvable:$true] %s27_s17 }
   0x4   :  { %p199_p0 = scmp.ne.s32.totalorder %s405_s0, %s198_s20  ;;  %p202_p1 = scmp.lt.u32.totalorder %s198_s20, %s405_s0 }
   0x6   :  { %p204_p2 = pnand %p202_p1, %p199_p0 }
   0x8   :  { %207 = shalt.err (!%p204_p2)
}
   0x9   :  { %s262_s25 = smov [#allocation2]   ;;  %s208_s1 = scalar_lea.vmem %s28_s17, 16 }
   0xa   :  { %20 = dma.hbm_to_smem %s405_s0, 16, %s262_s25, [#allocation4]  }
   0xb   :  { %p209_p3 = scmp.ne.s32.totalorder %s28_s17, %s208_s1  ;;  %p213_p4 = scmp.lt.s32.totalorder %s28_s17, %s28_s17 }
   0xc   :  { %p214_p5 = scmp.lt.s32.totalorder %s208_s1, %s208_s1 }
   0xe   :  { %p215_p6 = por %p214_p5, %p213_p4 }
  0x10   :  { %p216_p7 = pnand %p215_p6, %p209_p3 }
  0x12   :  { %219 = shalt.err (!%p216_p7)
}
  0x13   :  { %s263_s28 = smov [#allocation6]   ;;  %s37_s5 = sshll.u32 %s407_s2, 4  ;;  %s38_s5 = int_to_ptr.vmem [resolvable:$true] %s37_s5 }
  0x14   :  { %30 = dma.vmem_to_smem %s28_s17, 16, %s263_s28, [#allocation5]  }
  0x15   :  { %s220_s6 = scalar_lea.vmem %s38_s5, 16  ;;  %p225_p9 = scmp.lt.s32.totalorder %s38_s5, %s38_s5 }
  0x16   :  { %p221_p8 = scmp.ne.s32.totalorder %s38_s5, %s220_s6  ;;  %p226_p10 = scmp.lt.s32.totalorder %s220_s6, %s220_s6 }
  0x18   :  { %p227_p11 = por %p226_p10, %p225_p9 }
  0x1a   :  { %p228_p12 = pnand %p227_p11, %p221_p8 }
  0x1c   :  { %231 = shalt.err (!%p228_p12)
}
  0x1d   :  { %s264_s0 = smov [#allocation7]  }
  0x1e   :  { %40 = dma.vmem_to_smem %s38_s5, 16, %s264_s0, [#allocation8]  }
  0x1f   :  { %254 = dma.done.wait [#allocation4], 16  }
  0x20   :  { %255 = vsyncadd [#allocation4], 4294967280 }
  0x21   :  { %256 = dma.done.wait [#allocation5], 16  }
  0x22   :  { %257 = vsyncadd [#allocation5], 4294967280 }
  0x23   :  { %258 = dma.done.wait [#allocation8], 16  }
  0x24   :  { %259 = vsyncadd [#allocation8], 4294967280 }
  0x25   :  { %52 = sfence }
  0x26   :  { %v53_v0 = vld [vmem:[%s408_s3] sm:$0xff]  ;;  %vm54_vm0 = vcmask 130048   ;;  %s314_s2 = sld [smem:[#allocation2 + $0x1]]  ;;  %s316_s9 = sld [smem:[#allocation6]] }
  0x27   :  { %v55_v1 = vsel %vm54_vm0, %v53_v0, -inf  ;;  %s318_s10 = sld [smem:[#allocation2 + $0x2]]  ;;  %s320_s3 = sld [smem:[#allocation7]] }
  0x28   :  { %56 = vmax.xlane.f32.xlu0 %v55_v1  ;;  %s322_s11 = sld [smem:[#allocation6 + $0x1]]  ;;  %s326_s13 = sld [smem:[#allocation6 + $0x2]] }
  0x29   :  { %s324_s12 = sld [smem:[#allocation7 + $0x1]]  ;;  %s328_s14 = sld [smem:[#allocation7 + $0x2]] }
  0x2a   :  { %s330_s15 = sld [smem:[#allocation2 + $0x3]]  ;;  %s336_s18 = sld [smem:[#allocation2 + $0x4]] }
  0x2b   :  { %s332_s16 = sld [smem:[#allocation6 + $0x3]]  ;;  %s338_s19 = sld [smem:[#allocation6 + $0x4]] }
  0x2c   :  { %s334_s17 = sld [smem:[#allocation7 + $0x3]]  ;;  %s340_s20 = sld [smem:[#allocation7 + $0x4]]  ;;  %v69_v10 = vstv %s316_s9  ;;  %v73_v11 = vstv %s314_s2 }
  0x2d   :  { %s342_s21 = sld [smem:[#allocation2 + $0x5]]  ;;  %s348_s24 = sld [smem:[#allocation2 + $0x6]]  ;;  %v82_v12 = vstv %s318_s10  ;;  %v71_v14 = vstv %s320_s3 }
  0x2e   :  { %s344_s22 = sld [smem:[#allocation6 + $0x5]]  ;;  %s350_s25 = sld [smem:[#allocation6 + $0x6]]  ;;  %v76_v15 = vstv %s322_s11  ;;  %v85_v17 = vstv %s326_s13 }
  0x2f   :  { %s346_s23 = sld [smem:[#allocation7 + $0x5]]  ;;  %s352_s26 = sld [smem:[#allocation7 + $0x6]]  ;;  %v79_v16 = vstv %s324_s12  ;;  %v88_v18 = vstv %s328_s14 }
  0x30   :  { %s354_s27 = sld [smem:[#allocation2 + $0x7]]  ;;  %s366_s29 = sld [smem:[#allocation2 + $0x8]]  ;;  %v91_v19 = vstv %s330_s15  ;;  %v100_v23 = vstv %s336_s18 }
  0x31   :  { %s356_s1 = sld [smem:[#allocation6 + $0x7]]  ;;  %v94_v20 = vstv %s332_s16  ;;  %s372_s30 = sld [smem:[#allocation6 + $0x8]]  ;;  %v103_v24 = vstv %s338_s19 }
  0x32   :  { %s361_s28 = sld [smem:[#allocation7 + $0x7]]  ;;  %v97_v22 = vstv %s334_s17  ;;  %v106_v25 = vstv %s340_s20  ;;  %s381_s5 = sld [smem:[#allocation7 + $0x8]] }
  0x33   :  { %v109_v26 = vstv %s342_s21  ;;  %v118_v29 = vstv %s348_s24  ;;  %s265_s6 = smov [#allocation9]  }
  0x34   :  { %v112_v27 = vstv %s344_s22  ;;  %v121_v30 = vstv %s350_s25  ;;  %s155_s0 = sshll.u32 %s265_s6, 4  ;;  %s156_s0 = int_to_ptr.vmem [resolvable:$true] %s155_s0 }
  0x35   :  { %v115_v28 = vstv %s346_s23  ;;  %v124_v33 = vstv %s352_s26  ;;  %s232_s7 = scalar_lea.vmem %s156_s0, 128  ;;  %p237_p0 = scmp.lt.s32.totalorder %s156_s0, %s156_s0 }
  0x36   :  { %v127_v34 = vstv %s354_s27  ;;  %v136_v43 = vstv %s366_s29  ;;  %p233_p13 = scmp.ne.s32.totalorder %s156_s0, %s232_s7  ;;  %p238_p1 = scmp.lt.s32.totalorder %s232_s7, %s232_s7 }
  0x37   :  { %v130_v37 = vstv %s356_s1  ;;  %v139_v46 = vstv %s372_s30 }
  0x38   :  { %v133_v40 = vstv %s361_s28  ;;  %v142_v51 = vstv %s381_s5  ;;  %p239_p2 = por %p238_p1, %p237_p0 }
  0x3a   :  { %p240_p3 = pnand %p239_p2, %p233_p13 }
  0xb5   :  { %v57_v2 = vpop.xlane.xlu0 %56 }
  0xb6   :  { %v58_v3 = vsub.f32 %v53_v0, %v57_v2 }
  0xb8   :  { %v59_v4 = vmul.f32 1.442695, %v58_v3 }
  0xba   :  { %194 = vpow2.f32 %v59_v4 }
  0xc4   :  { %v195_v5 = vpop.eup %194 }
  0xc5   :  { %v61_v6 = vsel %vm54_vm0, %v195_v5, 0.0 }
  0xc6   :  { %62 = vadd.xlane.f32.xlu0 %v61_v6 }
 0x153   :  { %v63_v7 = vpop.xlane.xlu0 %62 }
 0x154   :  { %196 = vlog2.f32 %v63_v7 }
 0x15e   :  { %v197_v8 = vpop.eup %196 }
 0x15f   :  { %v65_v9 = vmul.f32 0.6931472, %v197_v8 }
 0x161   :  { %v66_v13 = vadd.f32 %v65_v9, %v57_v2 }
 0x163   :  { %v67_v21 = vsub.f32 %v66_v13, %v53_v0 }
 0x165   :  { %vm74_vm1 = vcmp.ge.f32.partialorder %v67_v21, %v73_v11  ;;  %vm83_vm2 = vcmp.ge.f32.partialorder %v67_v21, %v82_v12  ;;  %vm92_vm3 = vcmp.ge.f32.partialorder %v67_v21, %v91_v19  ;;  %vm101_vm4 = vcmp.ge.f32.partialorder %v67_v21, %v100_v23 }
 0x166   :  { %v77_v31 = vsel %vm74_vm1, %v76_v15, %v69_v10  ;;  %v80_v32 = vsel %vm74_vm1, %v79_v16, %v71_v14  ;;  %vm110_vm5 = vcmp.ge.f32.partialorder %v67_v21, %v109_v26  ;;  %vm119_vm6 = vcmp.ge.f32.partialorder %v67_v21, %v118_v29 }
 0x167   :  { %v86_v35 = vsel %vm83_vm2, %v85_v17, %v77_v31  ;;  %v89_v36 = vsel %vm83_vm2, %v88_v18, %v80_v32  ;;  %vm128_vm7 = vcmp.ge.f32.partialorder %v67_v21, %v127_v34  ;;  %vm137_vm8 = vcmp.ge.f32.partialorder %v67_v21, %v136_v43 }
 0x168   :  { %v95_v38 = vsel %vm92_vm3, %v94_v20, %v86_v35  ;;  %v98_v39 = vsel %vm92_vm3, %v97_v22, %v89_v36 }
 0x169   :  { %v104_v41 = vsel %vm101_vm4, %v103_v24, %v95_v38  ;;  %v107_v42 = vsel %vm101_vm4, %v106_v25, %v98_v39 }
 0x16a   :  { %v113_v44 = vsel %vm110_vm5, %v112_v27, %v104_v41  ;;  %v116_v45 = vsel %vm110_vm5, %v115_v28, %v107_v42 }
 0x16b   :  { %v122_v47 = vsel %vm119_vm6, %v121_v30, %v113_v44  ;;  %v125_v48 = vsel %vm119_vm6, %v124_v33, %v116_v45 }
 0x16c   :  { %v131_v49 = vsel %vm128_vm7, %v130_v37, %v122_v47  ;;  %v134_v50 = vsel %vm128_vm7, %v133_v40, %v125_v48 }
 0x16d   :  { %v140_v52 = vsel %vm137_vm8, %v139_v46, %v131_v49  ;;  %v143_v54 = vsel %vm137_vm8, %v142_v51, %v134_v50 }
 0x16e   :  { %v144_v53 = vsub.f32 %v67_v21, %v140_v52 }
 0x170   :  { %v145_v55 = vmul.f32 %v144_v53, %v143_v54 }
 0x172   :  { %v146_v56 = vadd.f32 %v145_v55, %v140_v52 }
 0x174   :  { %v147_v57 = vsub.f32 0.0, %v146_v56 }
 0x176   :  { %148 = vst.msk [vmem:[#allocation9] sm:$0xff] %vm54_vm0, %v147_v57 }
 0x177   :  { %243 = shalt.err (!%p240_p3)
}
 0x178   :  { %s244_s9 = scalar_lea.hbm %s409_s4, 128 }
 0x179   :  { %p245_p4 = scmp.ne.s32.totalorder %s409_s4, %s244_s9  ;;  %p248_p5 = scmp.lt.u32.totalorder %s244_s9, %s409_s4 }
 0x17b   :  { %p250_p6 = pnand %p248_p5, %p245_p4 }
 0x17d   :  { %253 = shalt.err (!%p250_p6)
}
 0x17e   :  { %158 = dma.vmem_to_hbm [thread:$0]  %s156_s0, 128, %s409_s4, [#allocation3]  }
 0x17f   :  { %260 = dma.done.wait [#allocation3], 128  }
 0x180   :  { %261 = vsyncadd [#allocation3], 4294967168 }
 0x181   :  { %162 = vsyncpa [#allocation3], 1 }
 0x182   :  { %163 = vsyncpa [#allocation4], 1 }
 0x183   :  { %164 = vsyncpa [#allocation5], 1 }
 0x184   :  { %165 = vsyncpa [#allocation8], 1 }

</bundles_post_ra>
